<compile_context>
chip_gen: v7x
topology: tpu7x:2x2x1
jax: 0.10.0
libtpu: 0.0.40
codegen_flags: <defaults>
</compile_context>

<pallas_src>
import jax
import jax.numpy as jnp
from jax.experimental import pallas as pl
from jax.experimental.pallas import tpu as pltpu


def _round_up(n, m):
    return ((n + m - 1) // m) * m


def critic_kernel(x_ref, w1_ref, b1_ref, w2_ref, b2_ref, w3t_ref, b3_ref, o_ref):
    # Layer 1: Linear + ReLU (MXU, f32 accumulation; x/w1 may be bf16).
    h = jnp.dot(x_ref[...], w1_ref[...], preferred_element_type=jnp.float32)
    h = jnp.maximum(h + b1_ref[...], 0.0)          # b1 is (1, H1) -> broadcast
    # Layer 2: Linear + ReLU (MXU).
    h = jnp.dot(h, w2_ref[...], preferred_element_type=jnp.float32)
    h = jnp.maximum(h + b2_ref[...], 0.0)
    # Output layer: Linear(H2, 1) done on the VPU + lane reduction, then stored
    # lane-dense as a (1, tile_b) row so the store / HBM writeback is a dense
    # vst instead of a masked, sublane-strided (tile_b, 1) column.
    v = jnp.sum(h * w3t_ref[...], axis=-1)         # (tile_b,)
    o_ref[...] = v[None, :] + b3_ref[...]          # b3 is (1, 1) -> broadcast


def _choose_tile_b(batch, d, tile_b):
    """Pick a lane/sublane-legal batch tile that fits VMEM comfortably."""
    # Multiple of 128 keeps both the (tile_b, D) x block (sublane rule) and the
    # (1, tile_b) lane-dense output block (lane rule) legal for partial tails.
    tile_b = max(128, _round_up(tile_b, 128))
    # Keep the double-buffered x stream around <= 8 MiB: safe under v5e's
    # 16 MiB default scoped VMEM, and leaves headroom on v7x's 64 MiB physical.
    vmem_budget = 8 * 1024 * 1024
    cap = max(128, (vmem_budget // (2 * 4 * max(d, 1))) // 128 * 128)
    tile_b = min(tile_b, cap)
    if batch <= tile_b:
        if batch >= 256:
            # >= 2 parallel grid steps so v7x megacore can use both TensorCores;
            # the extra ~0.35 us grid step is noise on single-TC v5e/v6e.
            tile_b = _round_up(pl.cdiv(batch, 2), 128)
        else:
            tile_b = batch          # single full-extent block (always legal)
    return tile_b


def critic_forward(x, params, *, tile_b=4096, layer1_bf16=False):
    """x: (B, input_size) f32. params: dict of w1,b1,w2,b2,w3,b3 (W as (in,out))."""
    w1, b1 = params["w1"], params["b1"]
    w2, b2 = params["w2"], params["b2"]
    w3, b3 = params["w3"], params["b3"]
    w3t = w3.reshape(1, -1)                        # (H2, 1) -> (1, H2)

    B, D = x.shape
    if layer1_bf16:
        # Halve the dominant HBM stream (x); layer-1 dot still accumulates f32.
        x = x.astype(jnp.bfloat16)
        w1 = w1.astype(jnp.bfloat16)

    tile_b = _choose_tile_b(B, D, tile_b)
    grid = (pl.cdiv(B, tile_b),)                   # no wrapper pad; partial tail
                                                   # block is masked by Pallas.

    const = lambda i: (0, 0)                       # params: fetched once, resident
    out = pl.pallas_call(
        critic_kernel,
        out_shape=jax.ShapeDtypeStruct((1, B), jnp.float32),   # lane-dense output
        grid_spec=pltpu.PrefetchScalarGridSpec(
            num_scalar_prefetch=0,
            grid=grid,
            in_specs=[
                pl.BlockSpec((tile_b, D), lambda i: (i, 0)),   # x streams
                pl.BlockSpec(w1.shape, const),
                pl.BlockSpec(b1.shape, const),
                pl.BlockSpec(w2.shape, const),
                pl.BlockSpec(b2.shape, const),
                pl.BlockSpec(w3t.shape, const),
                pl.BlockSpec(b3.shape, const),
            ],
            out_specs=pl.BlockSpec((1, tile_b), lambda i: (0, i)),
        ),
        compiler_params=pltpu.CompilerParams(
            dimension_semantics=("parallel",)),    # megacore-shard batch tiles
    )(x, w1, b1, w2, b2, w3t, b3)
    return out.reshape(B, 1)                       # match nn.Module's (B, 1)


def init_critic_params(key, input_size, hidden_layer_sizes=(20, 20)):
    """Deterministic init mimicking nn.Linear default (uniform ±1/sqrt(fan_in))."""
    params = {}
    sizes = [input_size] + list(hidden_layer_sizes) + [1]
    names = ["1", "2", "3"]
    for name, (fan_in, fan_out) in zip(names, zip(sizes[:-1], sizes[1:])):
        key, kw, kb = jax.random.split(key, 3)
        bound = 1.0 / (fan_in ** 0.5)
        # Stored as (in, out) so the kernel computes x @ W + b.
        params["w" + name] = jax.random.uniform(
            kw, (fan_in, fan_out), jnp.float32, -bound, bound
        )
        params["b" + name] = jax.random.uniform(
            kb, (1, fan_out), jnp.float32, -bound, bound
        )
    return params


def _reference(x, params):
    h = jnp.maximum(x @ params["w1"] + params["b1"], 0.0)
    h = jnp.maximum(h @ params["w2"] + params["b2"], 0.0)
    return h @ params["w3"] + params["b3"]


if __name__ == "__main__":
    key = jax.random.PRNGKey(0)
    INPUT_SIZE = 16
    HIDDEN = (20, 20)

    k_params, k_x1, k_x2, k_x3 = jax.random.split(key, 4)
    params = init_critic_params(k_params, INPUT_SIZE, HIDDEN)

    # Small base case: single full-extent block (grid of 1).
    B1 = 8
    x1 = jax.random.normal(k_x1, (B1, INPUT_SIZE), jnp.float32)
    out1 = jax.block_until_ready(critic_forward(x1, params))
    ref1 = _reference(x1, params)
    assert out1.shape == (B1, 1)
    assert jnp.allclose(out1, ref1, atol=1e-5, rtol=1e-5)

    # Multi-tile case with a partial (masked) last block — exercises the
    # no-pad cdiv path and the lane-dense output writeback.
    B2 = 300
    x2 = jax.random.normal(k_x2, (B2, INPUT_SIZE), jnp.float32)
    out2 = jax.block_until_ready(critic_forward(x2, params, tile_b=128))
    ref2 = _reference(x2, params)
    assert out2.shape == (B2, 1)
    assert jnp.allclose(out2, ref2, atol=1e-5, rtol=1e-5)

    # Default-tile path: 256 <= B <= tile_b splits into two parallel tiles
    # (megacore on v7x) with a partial second block.
    B3 = 1000
    x3 = jax.random.normal(k_x3, (B3, INPUT_SIZE), jnp.float32)
    out3 = jax.block_until_ready(critic_forward(x3, params))
    ref3 = _reference(x3, params)
    assert out3.shape == (B3, 1)
    assert jnp.allclose(out3, ref3, atol=1e-5, rtol=1e-5)

    print("KERNEL_OK")
</pallas_src>

<mosaic_0001>
module attributes {stable_mosaic.version = 11 : i64} {
  func.func @critic_kernel(%arg0: i32, %arg1: memref<8x16xf32, #tpu.memory_space<vmem>>, %arg2: memref<16x20xf32, #tpu.memory_space<vmem>>, %arg3: memref<1x20xf32, #tpu.memory_space<vmem>>, %arg4: memref<20x20xf32, #tpu.memory_space<vmem>>, %arg5: memref<1x20xf32, #tpu.memory_space<vmem>>, %arg6: memref<1x20xf32, #tpu.memory_space<vmem>>, %arg7: memref<1x1xf32, #tpu.memory_space<vmem>>, %arg8: memref<1x8xf32, #tpu.memory_space<vmem>>) attributes {dimension_semantics = [#tpu.dimension_semantics<parallel>], iteration_bounds = array<i64: 1>, scalar_prefetch = 0 : i64, scratch_operands = 0 : i64, tpu.core_type = #tpu.core_type<tc>, window_params = [{transform_indices = @transform_0, window_bounds = array<i64: 8, 16>}, {pipeline_mode = #tpu.pipeline_mode<synchronous>, transform_indices = @transform_1, window_bounds = array<i64: 16, 20>}, {pipeline_mode = #tpu.pipeline_mode<synchronous>, transform_indices = @transform_2, window_bounds = array<i64: 1, 20>}, {pipeline_mode = #tpu.pipeline_mode<synchronous>, transform_indices = @transform_3, window_bounds = array<i64: 20, 20>}, {pipeline_mode = #tpu.pipeline_mode<synchronous>, transform_indices = @transform_4, window_bounds = array<i64: 1, 20>}, {pipeline_mode = #tpu.pipeline_mode<synchronous>, transform_indices = @transform_5, window_bounds = array<i64: 1, 20>}, {pipeline_mode = #tpu.pipeline_mode<synchronous>, transform_indices = @transform_6, window_bounds = array<i64: 1, 1>}, {transform_indices = @transform_7, window_bounds = array<i64: 1, 8>}]} {
    %c0 = arith.constant 0 : index
    %c0_0 = arith.constant 0 : index
    %0 = vector.load %arg1[%c0, %c0_0] : memref<8x16xf32, #tpu.memory_space<vmem>>, vector<8x16xf32>
    %c0_1 = arith.constant 0 : index
    %c0_2 = arith.constant 0 : index
    %1 = vector.load %arg2[%c0_1, %c0_2] : memref<16x20xf32, #tpu.memory_space<vmem>>, vector<16x20xf32>
    %cst = arith.constant dense<0.000000e+00> : vector<8x20xf32>
    %2 = tpu.matmul %0, %1, %cst {dimension_numbers = #tpu.dot_dimension_numbers<[1], [0], [0], [1], [0, 0, 1, 1], [], []>} : vector<8x16xf32>, vector<16x20xf32>, vector<8x20xf32> -> vector<8x20xf32>
    %c0_3 = arith.constant 0 : index
    %c0_4 = arith.constant 0 : index
    %3 = vector.load %arg3[%c0_3, %c0_4] : memref<1x20xf32, #tpu.memory_space<vmem>>, vector<1x20xf32>
    %4 = vector.broadcast %3 : vector<1x20xf32> to vector<8x20xf32>
    %5 = arith.addf %2, %4 : vector<8x20xf32>
    %cst_5 = arith.constant 0.000000e+00 : f32
    %6 = vector.broadcast %cst_5 : f32 to vector<8x20xf32>
    %7 = arith.maximumf %5, %6 : vector<8x20xf32>
    %c0_6 = arith.constant 0 : index
    %c0_7 = arith.constant 0 : index
    %8 = vector.load %arg4[%c0_6, %c0_7] : memref<20x20xf32, #tpu.memory_space<vmem>>, vector<20x20xf32>
    %cst_8 = arith.constant dense<0.000000e+00> : vector<8x20xf32>
    %9 = tpu.matmul %7, %8, %cst_8 {dimension_numbers = #tpu.dot_dimension_numbers<[1], [0], [0], [1], [0, 0, 1, 1], [], []>} : vector<8x20xf32>, vector<20x20xf32>, vector<8x20xf32> -> vector<8x20xf32>
    %c0_9 = arith.constant 0 : index
    %c0_10 = arith.constant 0 : index
    %10 = vector.load %arg5[%c0_9, %c0_10] : memref<1x20xf32, #tpu.memory_space<vmem>>, vector<1x20xf32>
    %11 = vector.broadcast %10 : vector<1x20xf32> to vector<8x20xf32>
    %12 = arith.addf %9, %11 : vector<8x20xf32>
    %cst_11 = arith.constant 0.000000e+00 : f32
    %13 = vector.broadcast %cst_11 : f32 to vector<8x20xf32>
    %14 = arith.maximumf %12, %13 : vector<8x20xf32>
    %c0_12 = arith.constant 0 : index
    %c0_13 = arith.constant 0 : index
    %15 = vector.load %arg6[%c0_12, %c0_13] : memref<1x20xf32, #tpu.memory_space<vmem>>, vector<1x20xf32>
    %16 = vector.broadcast %15 : vector<1x20xf32> to vector<8x20xf32>
    %17 = arith.mulf %14, %16 : vector<8x20xf32>
    %cst_14 = arith.constant dense<0.000000e+00> : vector<8xf32>
    %18 = vector.multi_reduction <add>, %17, %cst_14 [1] : vector<8x20xf32> to vector<8xf32>
    %19 = vector.shape_cast %18 : vector<8xf32> to vector<1x8xf32>
    %c0_15 = arith.constant 0 : index
    %c0_16 = arith.constant 0 : index
    %20 = vector.load %arg7[%c0_15, %c0_16] : memref<1x1xf32, #tpu.memory_space<vmem>>, vector<1x1xf32>
    %21 = vector.broadcast %20 : vector<1x1xf32> to vector<1x8xf32>
    %22 = arith.addf %19, %21 : vector<1x8xf32>
    %c0_17 = arith.constant 0 : index
    %c0_18 = arith.constant 0 : index
    %23 = vector.load %arg8[%c0_17, %c0_18] : memref<1x8xf32, #tpu.memory_space<vmem>>, vector<1x8xf32>
    tpu.vector_store %arg8[%c0_17, %c0_18], %22 {strides = array<i32>} : memref<1x8xf32, #tpu.memory_space<vmem>>, vector<1x8xf32>,
    return
  }
  func.func @transform_0(%arg0: i32) -> (i32, i32) {
    %c0_i32 = arith.constant 0 : i32
    %c0_i32_0 = arith.constant 0 : i32
    return %arg0, %c0_i32 : i32, i32
  }
  func.func @transform_1(%arg0: i32) -> (i32, i32) {
    %c0_i32 = arith.constant 0 : i32
    %c0_i32_0 = arith.constant 0 : i32
    %c0_i32_1 = arith.constant 0 : i32
    return %c0_i32, %c0_i32_0 : i32, i32
  }
  func.func @transform_2(%arg0: i32) -> (i32, i32) {
    %c0_i32 = arith.constant 0 : i32
    %c0_i32_0 = arith.constant 0 : i32
    %c0_i32_1 = arith.constant 0 : i32
    return %c0_i32, %c0_i32_0 : i32, i32
  }
  func.func @transform_3(%arg0: i32) -> (i32, i32) {
    %c0_i32 = arith.constant 0 : i32
    %c0_i32_0 = arith.constant 0 : i32
    %c0_i32_1 = arith.constant 0 : i32
    return %c0_i32, %c0_i32_0 : i32, i32
  }
  func.func @transform_4(%arg0: i32) -> (i32, i32) {
    %c0_i32 = arith.constant 0 : i32
    %c0_i32_0 = arith.constant 0 : i32
    %c0_i32_1 = arith.constant 0 : i32
    return %c0_i32, %c0_i32_0 : i32, i32
  }
  func.func @transform_5(%arg0: i32) -> (i32, i32) {
    %c0_i32 = arith.constant 0 : i32
    %c0_i32_0 = arith.constant 0 : i32
    %c0_i32_1 = arith.constant 0 : i32
    return %c0_i32, %c0_i32_0 : i32, i32
  }
  func.func @transform_6(%arg0: i32) -> (i32, i32) {
    %c0_i32 = arith.constant 0 : i32
    %c0_i32_0 = arith.constant 0 : i32
    %c0_i32_1 = arith.constant 0 : i32
    return %c0_i32, %c0_i32_0 : i32, i32
  }
  func.func @transform_7(%arg0: i32) -> (i32, i32) {
    %c0_i32 = arith.constant 0 : i32
    %c0_i32_0 = arith.constant 0 : i32
    return %c0_i32, %arg0 : i32, i32
  }
}

</mosaic_0001>

<bundles_post_ra>
// kernel: tpu_custom_call.1
= control target key start
LH: loop header
LB: loop body
LE: loop exit
PB: predicated region body
PF: predicated region fallthrough
CT: control target
= control target key end

     0   :  { %s546_s0 = inlined_call_operand.hbm [shape: f32[8,16], index: 0, kind: input, shape index: {}]   ;;  %s547_s1 = inlined_call_operand.hbm [shape: f32[16,20], index: 1, kind: input, shape index: {}]   ;;  %s548_s2 = inlined_call_operand.vmem [shape: f32[1,20], index: 2, kind: input, shape index: {}]   ;;  %s549_s3 = inlined_call_operand.hbm [shape: f32[20,20], index: 3, kind: input, shape index: {}]   ;;  %s550_s4 = inlined_call_operand.vmem [shape: f32[1,20], index: 4, kind: input, shape index: {}]   ;;  %s551_s5 = inlined_call_operand.vmem [shape: f32[1,20], index: 5, kind: input, shape index: {}]   ;;  %s552_s6 = inlined_call_operand.<no memory space> [shape: f32[1,1], index: 6, kind: input, shape index: {}]   ;;  %s553_s7 = inlined_call_operand.hbm [shape: f32[1,8], index: 7, kind: output, shape index: {}]  }
   0x1   :  { %v12_v0 = vstv %s552_s6 }
   0x2   :  { %13 = vst [vmem:[#allocation2] sm:$0x1] %v12_v0 }
   0x3   :  { %14 = vsyncpa [#allocation4], 0 }
   0x4   :  { %15 = vsyncpa [#allocation7], 0 }
   0x5   :  { %16 = vsyncpa [#allocation5], 0  ;;  %s430_s26 = smov [#allocation6]   ;;  %s336_s30 = scalar_lea.hbm %s547_s1, 256 }
   0x6   :  { %s32_s27 = sshll.u32 %s430_s26, 4  ;;  %p337_p0 = scmp.ne.s32.totalorder %s547_s1, %s336_s30  ;;  %s33_s27 = int_to_ptr.vmem [resolvable:$true] %s32_s27 }
   0x7   :  { %p340_p1 = scmp.lt.u32.totalorder %s336_s30, %s547_s1 }
   0x9   :  { %p342_p2 = pnand %p340_p1, %p337_p0 }
   0xb   :  { %345 = shalt.err (!%p342_p2)
}
   0xc   :  { %s346_s6 = scalar_lea.vmem %s33_s27, 256  ;;  %p351_p4 = scmp.lt.s32.totalorder %s33_s27, %s33_s27 }
   0xd   :  { %p347_p3 = scmp.ne.s32.totalorder %s33_s27, %s346_s6  ;;  %p352_p5 = scmp.lt.s32.totalorder %s346_s6, %s346_s6 }
   0xf   :  { %p353_p6 = por %p352_p5, %p351_p4 }
  0x11   :  { %p354_p7 = pnand %p353_p6, %p347_p3 }
  0x13   :  { %357 = shalt.err (!%p354_p7)
}
  0x14   :  { %s431_s12 = smov 128   ;;  %s432_s13 = smov 8  }
  0x15   :  { %38 = dma.hbm_to_vmem [thread:$0]  %s547_s1, 256, %s33_s27, [#allocation7], %s431_s12, %s431_s12, %s432_s13  }
  0x16   :  { %s433_s16 = smov [#allocation3]   ;;  %s434_s18 = smov [#allocation8]  }
  0x17   :  { %s23_s17 = sshll.u32 %s433_s16, 4  ;;  %s46_s19 = sshll.u32 %s434_s18, 4  ;;  %s24_s17 = int_to_ptr.vmem [resolvable:$true] %s23_s17  ;;  %s47_s19 = int_to_ptr.vmem [resolvable:$true] %s46_s19 }
  0x18   :  { %s358_s22 = scalar_lea.hbm %s546_s0, 128 }
  0x19   :  { %p359_p8 = scmp.ne.s32.totalorder %s546_s0, %s358_s22  ;;  %p362_p9 = scmp.lt.u32.totalorder %s358_s22, %s546_s0 }
  0x1b   :  { %p364_p10 = pnand %p362_p9, %p359_p8 }
  0x1d   :  { %367 = shalt.err (!%p364_p10)
}
  0x1e   :  { %s368_s1 = scalar_lea.vmem %s24_s17, 128  ;;  %p373_p12 = scmp.lt.s32.totalorder %s24_s17, %s24_s17 }
  0x1f   :  { %p369_p11 = scmp.ne.s32.totalorder %s24_s17, %s368_s1  ;;  %p374_p13 = scmp.lt.s32.totalorder %s368_s1, %s368_s1 }
  0x21   :  { %p375_p0 = por %p374_p13, %p373_p12 }
  0x23   :  { %p376_p1 = pnand %p375_p0, %p369_p11 }
  0x25   :  { %379 = shalt.err (!%p376_p1)
}
  0x26   :  { %26 = dma.hbm_to_vmem [thread:$0]  %s546_s0, 128, %s24_s17, [#allocation4]  }
  0x27   :  { %s380_s8 = scalar_lea.hbm %s549_s3, 384 }
  0x28   :  { %p381_p2 = scmp.ne.s32.totalorder %s549_s3, %s380_s8  ;;  %p384_p3 = scmp.lt.u32.totalorder %s380_s8, %s549_s3 }
  0x2a   :  { %p386_p4 = pnand %p384_p3, %p381_p2 }
  0x2c   :  { %389 = shalt.err (!%p386_p4)
}
  0x2d   :  { %s390_s14 = scalar_lea.vmem %s47_s19, 384  ;;  %p395_p6 = scmp.lt.s32.totalorder %s47_s19, %s47_s19 }
  0x2e   :  { %p391_p5 = scmp.ne.s32.totalorder %s47_s19, %s390_s14  ;;  %p396_p7 = scmp.lt.s32.totalorder %s390_s14, %s390_s14 }
  0x30   :  { %p397_p8 = por %p396_p7, %p395_p6 }
  0x32   :  { %p398_p9 = pnand %p397_p8, %p391_p5 }
  0x34   :  { %401 = shalt.err (!%p398_p9)
}
  0x35   :  { %52 = dma.hbm_to_vmem [thread:$0]  %s549_s3, 384, %s47_s19, [#allocation7], %s431_s12, %s431_s12, %s432_s13  }
  0x36   :  { %424 = dma.done.wait [#allocation4], 128  }
  0x37   :  { %425 = vsyncadd [#allocation4], 4294967168 }
  0x38   :  { %426 = dma.done.wait [#allocation7], 640  }
  0x39   :  { %427 = vsyncadd [#allocation7], 4294966656  ;;  %v435_v1 = vmov 0.0|0.0   ;;  %vm436_vm0 = vmmov 0   ;;  %v437_v2 = vmov 0.0   ;;  %v69_v3 = vld [vmem:[#allocation6] sm:$0xff]  ;;  %v259_v26 = vlaneseq }
  0x3a   :  { %319 = vmatprep.subr.bf16.mxu0 %v435_v1  ;;  %307 = vmatprep.mubr.msk.f32.mxu0 %vm436_vm0, %v437_v2  ;;  %v70_v4 = vld [vmem:[#allocation6 + $0x8] sm:$0xff]  ;;  %v68_v6 = vld [vmem:[#allocation3] sm:$0xff]  ;;  %vm78_vm1 = vcmask 130048   ;;  %v153_v7 = vld [vmem:[#allocation8] sm:$0xff]  ;;  %vm167_vm2 = vcmask 1043456   ;;  %vm163_vm3 = vcmask 162816  }
  0x3b   :  { %322 = vmatprep.subr.bf16.mxu1 %v435_v1  ;;  %316 = vmatprep.mubr.msk.f32.mxu1 %vm436_vm0, %v437_v2  ;;  %v320_v5 = vpack.c.bf16 %v70_v4, %v69_v3  ;;  %v154_v8 = vld [vmem:[#allocation8 + $0x8] sm:$0xff]  ;;  %v155_v10 = vld [vmem:[#allocation8 + $0x10] sm:$0xf]  ;;  %v290_v11 = vld [vmem:[%s548_s2] ss:$0 sm:$0xff]  ;;  %v438_v16 = vmov 0  }
  0x3c   :  { %v323_v9 = vpack.c.bf16 %v154_v8, %v153_v7  ;;  %335 = vset.pattern.permute.xlu0 %v438_v16  ;;  %v292_v17 = vld [vmem:[%s550_s4] ss:$0 sm:$0xff]  ;;  %v260_v27 = vshrl.u32 %v259_v26, 7  ;;  %v266_v30 = vand.u32 127, %v259_v26  ;;  %s439_s2 = smov [#allocation9]   ;;  %vm272_vm4 = vcmask 57344  }
  0x3d   :  { %321 = vmatpush3.bf16.msra.mxu0 %v320_v5  ;;  %v295_v21 = vld [vmem:[%s551_s5] ss:$0 sm:$0xff]  ;;  %s280_s4 = sshll.u32 %s439_s2, 4  ;;  %s281_s4 = int_to_ptr.vmem [resolvable:$true] %s280_s4 }
  0x3e   :  { %324 = vmatpush3.bf16.msra.mxu1 %v323_v9  ;;  %v253_v25 = vld [vmem:[#allocation2] sm:$0x1]  ;;  %v261_v29 = vsub.s32 0, %v260_v27  ;;  %v269_v32 = vsub.s32 %v266_v30, %v260_v27  ;;  %s402_s5 = scalar_lea.vmem %s281_s4, 16  ;;  %s406_s19 = scalar_lea.vmem %s281_s4, 32 }
  0x3f   :  { %314 = vmatprep.subr.mxu1 %v437_v2  ;;  %p403_p10 = scmp.ne.s32.totalorder %s281_s4, %s402_s5  ;;  %p407_p11 = scmp.lt.s32.totalorder %s281_s4, %s281_s4 }
  0x40   :  { %308 = vmatmul.mubr.msk.f32.vlgmr.msra.gmra.mrb[0].mxu0 %vm78_vm1, %v68_v6  ;;  %p408_p12 = scmp.lt.s32.totalorder %s406_s19, %s402_s5 }
  0x42   :  { %315 = vmatpush3.msk.msra.mxu1 %vm167_vm2, %v155_v10  ;;  %p409_p13 = por %p408_p12, %p407_p11 }
  0x44   :  { %p410_p0 = pnand %p409_p13, %p403_p10 }
 0x113   :  { %v148_v12 = vpop.f32.mrb[0].mxu0 }
 0x114   :  { %v149_v13 = vadd.f32 %v290_v11, %v148_v12  ;;  %v309_v14 = vpop.f32.mrb[1].mxu0 }
 0x116   :  { %v152_v15 = vmax.f32 %v149_v13, 0.0 }
 0x118   :  { %317 = vmatmul.mubr.msk.f32.vlgmr.msra.gmra.mrb[0].mxu1 %vm163_vm3, %v152_v15 }
 0x1eb   :  { %v237_v18 = vpop.f32.mrb[0].mxu1 }
 0x1ec   :  { %v238_v19 = vadd.f32 %v292_v17, %v237_v18  ;;  %v318_v20 = vpop.f32.mrb[1].mxu1 }
 0x1ee   :  { %v241_v22 = vmax.f32 %v238_v19, 0.0 }
 0x1f0   :  { %v249_v23 = vmul.f32 %v295_v21, %v241_v22 }
 0x1f2   :  { %v250_v24 = vsel %vm163_vm3, %v249_v23, 0.0 }
 0x1f3   :  { %251 = vadd.xlane.f32.xlu0 %v250_v24 }
 0x209   :  { %256 = vperm.xlu0 %335, %v253_v25  }
 0x280   :  { %v252_v28 = vpop.xlane.xlu0 %251 }
 0x288   :  { %v257_v31 = vpop.permute.xlu0 %256 }
 0x289   :  { %v262_v33 = vrot.slane %v257_v31, %v261_v29 }
 0x28b   :  { %v263_v34 = vadd.f32 %v262_v33, %v252_v28 }
 0x28d   :  { %v270_v35 = vrot.slane %v263_v34, %v269_v32 }
 0x28f   :  { %273 = vst.msk [vmem:[#allocation9] sm:$0x1] %vm272_vm4, %v270_v35 }
 0x290   :  { %413 = shalt.err (!%p410_p0)
}
 0x291   :  { %s414_s22 = scalar_lea.hbm %s553_s7, 16 }
 0x292   :  { %p415_p1 = scmp.ne.s32.totalorder %s553_s7, %s414_s22  ;;  %p418_p2 = scmp.lt.u32.totalorder %s414_s22, %s553_s7 }
 0x294   :  { %p420_p3 = pnand %p418_p2, %p415_p1 }
 0x296   :  { %423 = shalt.err (!%p420_p3)
}
 0x297   :  { %283 = dma.vmem_to_hbm [thread:$0]  %s281_s4, 16, %s553_s7, [#allocation5]  }
 0x298   :  { %428 = dma.done.wait [#allocation5], 16  }
 0x299   :  { %429 = vsyncadd [#allocation5], 4294967280 }
 0x29a   :  { %287 = vsyncpa [#allocation4], 1 }
 0x29b   :  { %288 = vsyncpa [#allocation7], 1 }
 0x29c   :  { %289 = vsyncpa [#allocation5], 1 }

</bundles_post_ra>
